<compile_context>
chip_gen: v5e
topology: v5e:2x2
jax: 0.10.0
libtpu: 0.0.40
codegen_flags: <defaults>
</compile_context>

<pallas_src>
import functools

import jax
import jax.numpy as jnp
from jax.experimental import pallas as pl
from jax.experimental.pallas import tpu as pltpu


def _temporal_block_kernel(x_ref, w1f_ref, b1ds_ref, w2_ref, b2_ref, o_ref,
                           *, kernel_size, dilation, seq_len, c_out):
    """One batch-tile per grid step; batch folded into the lane axis.

    x_ref   : (C_in,    bt*L)     bf16  (bt batch elements side by side)
    w1f_ref : (2*C_out, K*C_in)   bf16  conv1 taps + fused 1x1 downsample rows
    b1ds_ref: (2*C_out, 1)        f32   [b1 ; b_downsample]
    w2_ref  : (C_out,   K*C_out)  bf16  conv2 taps
    b2_ref  : (C_out, 1)          f32
    o_ref   : (C_out,   bt*L)     bf16
    """
    K = kernel_size
    L = seq_len
    BL = x_ref.shape[-1]
    shifts = [(K - 1 - k) * dilation for k in range(K)]

    # Causal keep-masks, hoisted (one per distinct non-zero shift).  `local`
    # is the position *within* each batch element, so rolled values that wrap
    # across batch boundaries are zeroed exactly like the conv's zero padding
    # (this is the fused pad-by-(K-1)*dilation + chomp).
    lane = jax.lax.broadcasted_iota(jnp.int32, (1, BL), 1)
    local = lane % L
    keep = {s: local >= s for s in set(shifts) if s > 0}

    def stack_shifted(v_f32):
        # (C, BL) f32 -> (K*C, BL) bf16: rows [k*C:(k+1)*C] hold v shifted
        # right by shifts[k] (zeros shifted in).  f32 pieces keep the sublane
        # concatenation tile-aligned; one cast to bf16 feeds the MXU.
        cols = []
        for s in shifts:
            if s == 0:
                cols.append(v_f32)
            else:
                r = pltpu.roll(v_f32, s, axis=1)          # XLU lane rotation
                cols.append(jnp.where(keep[s], r, 0.0))
        return jnp.concatenate(cols, axis=0).astype(jnp.bfloat16)

    x = x_ref[...].astype(jnp.float32)                    # (C_in, BL)
    xs = stack_shifted(x)                                 # (K*C_in, BL) bf16

    # conv1 + fused 1x1 downsample: single dot with K*C_in-deep contraction
    # and 2*C_out output rows, f32 accumulation on the MXU.
    acc = jnp.dot(w1f_ref[...], xs, preferred_element_type=jnp.float32)
    acc = acc + b1ds_ref[...]
    h1 = jnp.maximum(acc[:c_out], 0.0)                    # (C_out, BL) f32
    res = acc[c_out:]                                     # (C_out, BL) f32

    # conv2: h1 never round-trips VMEM; its stacked operand goes to the MXU
    # in bf16.
    hs = stack_shifted(h1)                                # (K*C_out, BL) bf16
    acc2 = jnp.dot(w2_ref[...], hs, preferred_element_type=jnp.float32)
    h2 = jnp.maximum(acc2 + b2_ref[...], 0.0)

    # TODO(synk): dropout1 / dropout2 are identity (eval / inference mode).
    o_ref[...] = jnp.maximum(h2 + res, 0.0).astype(o_ref.dtype)


def _pick_batch_tile(n, length, target_lanes=2048):
    """Largest batch tile that (a) keeps the grid at >= 2 steps so both v7x
    TensorCores get work, (b) divides the batch, (c) targets a wide lane
    extent so MXU pushes and per-grid-step overhead are amortized."""
    bt = max(1, target_lanes // max(length, 1))
    bt = min(bt, max(1, n // 2))
    while n % bt:
        bt -= 1
    return bt


def temporal_block(x, w1, b1, w2, b2, wds, bds, *,
                   kernel_size, dilation, batch_tile=None,
                   compute_dtype=jnp.bfloat16):
    """x: (N, C_in, L) in PyTorch NCL layout.  Returns (N, C_out, L) bf16.

    Weight layouts (as produced by _make_params):
      w1 : (K, C_out, C_in), w2 : (K, C_out, C_out), wds : (C_out, C_in)
      b1, b2, bds : (C_out, 1)
    Assumes the standard TCN setting padding == (kernel_size - 1) * dilation
    (the module's Chomp only yields a length-L causal conv in that case).
    """
    N, C_in, L = x.shape
    K, C_out, _ = w1.shape
    assert K == kernel_size
    bt = batch_tile if batch_tile is not None else _pick_batch_tile(N, L)
    assert N % bt == 0, "batch_tile must divide the batch size"
    BL = bt * L
    assert BL % 128 == 0 or bt == N, (
        "batch_tile*L must be a multiple of 128 (or cover the whole batch)")
    grid = (N // bt,)

    # Channel-major, batch-folded-into-lanes layout: (C_in, N*L).  The one-off
    # wrapper transpose is accepted so the in-kernel matmul N-dim is bt*L and
    # every load/store is lane-dense.
    x2 = jnp.transpose(x.astype(compute_dtype), (1, 0, 2)).reshape(C_in, N * L)

    # conv1 taps reshaped to (C_out, K*C_in); the 1x1 downsample is appended
    # as C_out extra rows that only touch the shift-0 tap's columns.
    w1r = jnp.transpose(w1, (1, 0, 2)).reshape(C_out, K * C_in)
    wds_pad = jnp.zeros((C_out, K * C_in), w1.dtype).at[:, (K - 1) * C_in:].set(wds)
    w1f = jnp.concatenate([w1r, wds_pad], axis=0).astype(compute_dtype)
    w2r = jnp.transpose(w2, (1, 0, 2)).reshape(C_out, K * C_out).astype(compute_dtype)
    b1ds = jnp.concatenate([b1, bds], axis=0).astype(jnp.float32).reshape(2 * C_out, 1)
    b2r = b2.astype(jnp.float32).reshape(C_out, 1)

    itemsize = jnp.dtype(compute_dtype).itemsize
    flops = 2 * N * L * (2 * C_out * K * C_in + C_out * K * C_out)
    bytes_accessed = (N * C_in * L * itemsize                       # x (bf16)
                      + N * C_out * L * itemsize                    # y (bf16)
                      + (2 * C_out * K * C_in + C_out * K * C_out) * itemsize
                      + 3 * C_out * 4)                               # biases

    kern = functools.partial(_temporal_block_kernel, kernel_size=K,
                             dilation=dilation, seq_len=L, c_out=C_out)

    # TODO(synk): for very long sequences additionally tile L with a
    # (K-1)*dilation halo, sized against v7x's 64 MiB VMEM (set
    # vmem_limit_bytes explicitly); whole-(bt*L) blocks are fine at these sizes.
    out = pl.pallas_call(
        kern,
        out_shape=jax.ShapeDtypeStruct((C_out, N * L), compute_dtype),
        grid_spec=pltpu.PrefetchScalarGridSpec(
            num_scalar_prefetch=0,
            grid=grid,
            in_specs=[
                pl.BlockSpec((C_in, BL), lambda n: (0, n)),
                pl.BlockSpec((2 * C_out, K * C_in), lambda n: (0, 0)),
                pl.BlockSpec((2 * C_out, 1), lambda n: (0, 0)),
                pl.BlockSpec((C_out, K * C_out), lambda n: (0, 0)),
                pl.BlockSpec((C_out, 1), lambda n: (0, 0)),
            ],
            out_specs=pl.BlockSpec((C_out, BL), lambda n: (0, n)),
        ),
        compiler_params=pltpu.CompilerParams(
            dimension_semantics=("parallel",)),
        cost_estimate=pl.CostEstimate(flops=flops, transcendentals=0,
                                      bytes_accessed=bytes_accessed),
    )(x2, w1f, b1ds, w2r, b2r)

    # Back to PyTorch NCL layout.  In a stacked TCN the channel-major layout
    # would be kept between blocks and this transpose done once at the ends.
    return jnp.transpose(out.reshape(C_out, N, L), (1, 0, 2))


def _weight_norm(v):
    """Effective weight of torch weight_norm (dim=0): g * v / ||v||, with
    g = ||v|| at initialization (so the effective weight equals v)."""
    norm = jnp.sqrt(jnp.sum(v * v, axis=(1, 2), keepdims=True))
    return norm * v / norm


def _make_params(key, n_inputs, n_outputs, kernel_size):
    """Mirror TemporalBlock.init_weights (init=True) in torch layouts, then
    re-pack for the kernel: conv weight (C_out, C_in, K) -> (K, C_out, C_in),
    biases -> (C_out, 1)."""
    k1, k2, k3, k4, k5, k6 = jax.random.split(key, 6)

    # conv1: v ~ N(0, 0.001), v[:, 0, :] += 1/K
    v1 = 0.001 * jax.random.normal(k1, (n_outputs, n_inputs, kernel_size),
                                   jnp.float32)
    v1 = v1.at[:, 0, :].add(1.0 / kernel_size)
    w1_t = _weight_norm(v1)
    b1 = 1e-6 * jax.random.normal(k2, (n_outputs,), jnp.float32)

    # conv2: v ~ N(0, 0.001), v += 1/K
    v2 = 0.001 * jax.random.normal(k3, (n_outputs, n_outputs, kernel_size),
                                   jnp.float32)
    v2 = v2 + 1.0 / kernel_size
    w2_t = _weight_norm(v2)
    b2 = 1e-6 * jax.random.normal(k4, (n_outputs,), jnp.float32)

    # downsample 1x1 conv: weight ~ N(0, 0.1); bias keeps torch default uniform
    wds_t = 0.1 * jax.random.normal(k5, (n_outputs, n_inputs, 1), jnp.float32)
    bound = 1.0 / jnp.sqrt(jnp.float32(n_inputs))
    bds = jax.random.uniform(k6, (n_outputs,), jnp.float32, -bound, bound)

    w1 = jnp.transpose(w1_t, (2, 0, 1))        # (K, C_out, C_in)
    w2 = jnp.transpose(w2_t, (2, 0, 1))        # (K, C_out, C_out)
    wds = wds_t[:, :, 0]                       # (C_out, C_in)
    return (w1, b1.reshape(-1, 1), w2, b2.reshape(-1, 1),
            wds, bds.reshape(-1, 1))


def _reference(x, w1, b1, w2, b2, wds, bds, *, dilation,
               compute_dtype=jnp.bfloat16):
    """Pure-JAX reference of the same forward pass, mimicking the kernel's
    bf16-input / f32-accumulation numerics (for a tight sanity check)."""
    f32 = jnp.float32
    cast = lambda a: a.astype(compute_dtype).astype(f32)
    xb, w1b, w2b, wdsb = cast(x), cast(w1), cast(w2), cast(wds)
    N, _, L = x.shape
    hi = jax.lax.Precision.HIGHEST

    def causal_conv(inp, w, b):
        K = w.shape[0]
        acc = jnp.zeros((N, w.shape[1], L), f32)
        for k in range(K):
            shift = (K - 1 - k) * dilation
            shifted = jnp.pad(inp, ((0, 0), (0, 0), (shift, 0)))[:, :, :L]
            acc = acc + jnp.einsum('oc,ncl->nol', w[k], shifted, precision=hi)
        return acc + b[None]

    h1 = cast(jnp.maximum(causal_conv(xb, w1b, b1), 0.0))
    h2 = jnp.maximum(causal_conv(h1, w2b, b2), 0.0)
    res = jnp.einsum('oc,ncl->nol', wdsb, xb, precision=hi) + bds[None]
    return jnp.maximum(h2 + res, 0.0)


if __name__ == "__main__":
    # TemporalBlock(n_inputs=8, n_outputs=16, kernel_size=3, stride=1,
    #               dilation=2, padding=(3-1)*2=4)  -- causal TCN settings.
    # L = 128 keeps the length axis lane-dense (multiple of 128).
    N, C_IN, C_OUT, L = 2, 8, 16, 128
    K, DILATION = 3, 2

    key = jax.random.PRNGKey(0)
    kx, kp = jax.random.split(key)
    x = jax.random.normal(kx, (N, C_IN, L), jnp.float32)   # PyTorch NCL layout
    w1, b1, w2, b2, wds, bds = _make_params(kp, C_IN, C_OUT, K)

    y = temporal_block(x, w1, b1, w2, b2, wds, bds,
                       kernel_size=K, dilation=DILATION)
    y = jax.block_until_ready(y)

    y_ref = _reference(x, w1, b1, w2, b2, wds, bds, dilation=DILATION)
    assert y.shape == (N, C_OUT, L)
    assert y.dtype == jnp.bfloat16
    y32 = y.astype(jnp.float32)
    err = float(jnp.max(jnp.abs(y32 - y_ref)))
    assert jnp.allclose(y32, y_ref, atol=5e-2, rtol=2e-2), err

    print("KERNEL_OK")
</pallas_src>

<mosaic_0001>
module attributes {stable_mosaic.version = 11 : i64} {
  func.func @_temporal_block_kernel(%arg0: i32, %arg1: memref<8x128xbf16, #tpu.memory_space<vmem>>, %arg2: memref<32x24xbf16, #tpu.memory_space<vmem>>, %arg3: memref<32x1xf32, #tpu.memory_space<vmem>>, %arg4: memref<16x48xbf16, #tpu.memory_space<vmem>>, %arg5: memref<16x1xf32, #tpu.memory_space<vmem>>, %arg6: memref<16x128xbf16, #tpu.memory_space<vmem>>) attributes {dimension_semantics = [#tpu.dimension_semantics<parallel>], iteration_bounds = array<i64: 2>, scalar_prefetch = 0 : i64, scratch_operands = 0 : i64, tpu.core_type = #tpu.core_type<tc>, window_params = [{transform_indices = @transform_0, window_bounds = array<i64: 8, 128>}, {pipeline_mode = #tpu.pipeline_mode<synchronous>, transform_indices = @transform_1, window_bounds = array<i64: 32, 24>}, {pipeline_mode = #tpu.pipeline_mode<synchronous>, transform_indices = @transform_2, window_bounds = array<i64: 32, 1>}, {pipeline_mode = #tpu.pipeline_mode<synchronous>, transform_indices = @transform_3, window_bounds = array<i64: 16, 48>}, {pipeline_mode = #tpu.pipeline_mode<synchronous>, transform_indices = @transform_4, window_bounds = array<i64: 16, 1>}, {transform_indices = @transform_5, window_bounds = array<i64: 16, 128>}]} {
    %0 = tpu.iota {dimensions = array<i32: 1>} : vector<1x128xi32>
    %c128_i32 = arith.constant 128 : i32
    %c0_i32 = arith.constant 0 : i32
    %1 = arith.cmpi eq, %c128_i32, %c0_i32 : i32
    %c1_i32 = arith.constant 1 : i32
    %2 = arith.select %1, %c1_i32, %c128_i32 : i32
    %3 = vector.broadcast %2 : i32 to vector<1x128xi32>
    %4 = arith.remsi %0, %3 : vector<1x128xi32>
    %c0_i32_0 = arith.constant 0 : i32
    %5 = vector.broadcast %c0_i32_0 : i32 to vector<1x128xi32>
    %6 = arith.cmpi ne, %4, %5 : vector<1x128xi32>
    %c0_i32_1 = arith.constant 0 : i32
    %7 = vector.broadcast %c0_i32_1 : i32 to vector<1x128xi32>
    %8 = arith.cmpi slt, %4, %7 : vector<1x128xi32>
    %c0_i32_2 = arith.constant 0 : i32
    %9 = arith.cmpi slt, %2, %c0_i32_2 : i32
    %10 = vector.broadcast %9 : i1 to vector<1x128xi1>
    %11 = vector.broadcast %10 : vector<1x128xi1> to vector<1x128xi1>
    %12 = arith.xori %8, %11 : vector<1x128xi1>
    %13 = arith.andi %12, %6 : vector<1x128xi1>
    %14 = vector.broadcast %2 : i32 to vector<1x128xi32>
    %15 = arith.addi %4, %14 : vector<1x128xi32>
    %16 = arith.select %13, %15, %4 : vector<1x128xi1>, vector<1x128xi32>
    %c2_i32 = arith.constant 2 : i32
    %17 = vector.broadcast %c2_i32 : i32 to vector<1x128xi32>
    %18 = arith.cmpi sge, %16, %17 : vector<1x128xi32>
    %c4_i32 = arith.constant 4 : i32
    %19 = vector.broadcast %c4_i32 : i32 to vector<1x128xi32>
    %20 = arith.cmpi sge, %16, %19 : vector<1x128xi32>
    %c0 = arith.constant 0 : index
    %c0_3 = arith.constant 0 : index
    %21 = vector.load %arg1[%c0, %c0_3] : memref<8x128xbf16, #tpu.memory_space<vmem>>, vector<8x128xbf16>
    %22 = arith.extf %21 : vector<8x128xbf16> to vector<8x128xf32>
    %c4_i32_4 = arith.constant 4 : i32
    %23 = tpu.dynamic_rotate %22 by %c4_i32_4 dim 1 : vector<8x128xf32>, i32 -> vector<8x128xf32>
    %cst = arith.constant 0.000000e+00 : f32
    %24 = vector.shape_cast %20 : vector<1x128xi1> to vector<1x128xi1>
    %25 = vector.broadcast %24 : vector<1x128xi1> to vector<8x128xi1>
    %26 = vector.broadcast %cst : f32 to vector<8x128xf32>
    %27 = arith.select %25, %23, %26 : vector<8x128xi1>, vector<8x128xf32>
    %c2_i32_5 = arith.constant 2 : i32
    %28 = tpu.dynamic_rotate %22 by %c2_i32_5 dim 1 : vector<8x128xf32>, i32 -> vector<8x128xf32>
    %cst_6 = arith.constant 0.000000e+00 : f32
    %29 = vector.shape_cast %18 : vector<1x128xi1> to vector<1x128xi1>
    %30 = vector.broadcast %29 : vector<1x128xi1> to vector<8x128xi1>
    %31 = vector.broadcast %cst_6 : f32 to vector<8x128xf32>
    %32 = arith.select %30, %28, %31 : vector<8x128xi1>, vector<8x128xf32>
    %33 = tpu.concatenate %27, %32, %22 in 0 : vector<8x128xf32>, vector<8x128xf32>, vector<8x128xf32> -> vector<24x128xf32>
    %34 = arith.truncf %33 : vector<24x128xf32> to vector<24x128xbf16>
    %c0_7 = arith.constant 0 : index
    %c0_8 = arith.constant 0 : index
    %35 = vector.load %arg2[%c0_7, %c0_8] : memref<32x24xbf16, #tpu.memory_space<vmem>>, vector<32x24xbf16>
    %cst_9 = arith.constant dense<0.000000e+00> : vector<32x128xf32>
    %36 = tpu.matmul %35, %34, %cst_9 {dimension_numbers = #tpu.dot_dimension_numbers<[1], [0], [0], [1], [0, 0, 1, 1], [], []>} : vector<32x24xbf16>, vector<24x128xbf16>, vector<32x128xf32> -> vector<32x128xf32>
    %c0_10 = arith.constant 0 : index
    %c0_11 = arith.constant 0 : index
    %37 = vector.load %arg3[%c0_10, %c0_11] : memref<32x1xf32, #tpu.memory_space<vmem>>, vector<32x1xf32>
    %38 = vector.broadcast %37 : vector<32x1xf32> to vector<32x128xf32>
    %39 = arith.addf %36, %38 : vector<32x128xf32>
    %40 = vector.extract_strided_slice %39 {offsets = [0, 0], sizes = [16, 128], strides = [1, 1]} : vector<32x128xf32> to vector<16x128xf32>
    %cst_12 = arith.constant 0.000000e+00 : f32
    %41 = vector.broadcast %cst_12 : f32 to vector<16x128xf32>
    %42 = arith.maximumf %40, %41 : vector<16x128xf32>
    %43 = vector.extract_strided_slice %39 {offsets = [16, 0], sizes = [16, 128], strides = [1, 1]} : vector<32x128xf32> to vector<16x128xf32>
    %c4_i32_13 = arith.constant 4 : i32
    %44 = tpu.dynamic_rotate %42 by %c4_i32_13 dim 1 : vector<16x128xf32>, i32 -> vector<16x128xf32>
    %cst_14 = arith.constant 0.000000e+00 : f32
    %45 = vector.shape_cast %20 : vector<1x128xi1> to vector<1x128xi1>
    %46 = vector.broadcast %45 : vector<1x128xi1> to vector<16x128xi1>
    %47 = vector.broadcast %cst_14 : f32 to vector<16x128xf32>
    %48 = arith.select %46, %44, %47 : vector<16x128xi1>, vector<16x128xf32>
    %c2_i32_15 = arith.constant 2 : i32
    %49 = tpu.dynamic_rotate %42 by %c2_i32_15 dim 1 : vector<16x128xf32>, i32 -> vector<16x128xf32>
    %cst_16 = arith.constant 0.000000e+00 : f32
    %50 = vector.shape_cast %18 : vector<1x128xi1> to vector<1x128xi1>
    %51 = vector.broadcast %50 : vector<1x128xi1> to vector<16x128xi1>
    %52 = vector.broadcast %cst_16 : f32 to vector<16x128xf32>
    %53 = arith.select %51, %49, %52 : vector<16x128xi1>, vector<16x128xf32>
    %54 = tpu.concatenate %48, %53, %42 in 0 : vector<16x128xf32>, vector<16x128xf32>, vector<16x128xf32> -> vector<48x128xf32>
    %55 = arith.truncf %54 : vector<48x128xf32> to vector<48x128xbf16>
    %c0_17 = arith.constant 0 : index
    %c0_18 = arith.constant 0 : index
    %56 = vector.load %arg4[%c0_17, %c0_18] : memref<16x48xbf16, #tpu.memory_space<vmem>>, vector<16x48xbf16>
    %cst_19 = arith.constant dense<0.000000e+00> : vector<16x128xf32>
    %57 = tpu.matmul %56, %55, %cst_19 {dimension_numbers = #tpu.dot_dimension_numbers<[1], [0], [0], [1], [0, 0, 1, 1], [], []>} : vector<16x48xbf16>, vector<48x128xbf16>, vector<16x128xf32> -> vector<16x128xf32>
    %c0_20 = arith.constant 0 : index
    %c0_21 = arith.constant 0 : index
    %58 = vector.load %arg5[%c0_20, %c0_21] : memref<16x1xf32, #tpu.memory_space<vmem>>, vector<16x1xf32>
    %59 = vector.broadcast %58 : vector<16x1xf32> to vector<16x128xf32>
    %60 = arith.addf %57, %59 : vector<16x128xf32>
    %cst_22 = arith.constant 0.000000e+00 : f32
    %61 = vector.broadcast %cst_22 : f32 to vector<16x128xf32>
    %62 = arith.maximumf %60, %61 : vector<16x128xf32>
    %63 = arith.addf %62, %43 : vector<16x128xf32>
    %cst_23 = arith.constant 0.000000e+00 : f32
    %64 = vector.broadcast %cst_23 : f32 to vector<16x128xf32>
    %65 = arith.maximumf %63, %64 : vector<16x128xf32>
    %66 = arith.truncf %65 : vector<16x128xf32> to vector<16x128xbf16>
    %c0_24 = arith.constant 0 : index
    %c0_25 = arith.constant 0 : index
    %67 = vector.load %arg6[%c0_24, %c0_25] : memref<16x128xbf16, #tpu.memory_space<vmem>>, vector<16x128xbf16>
    tpu.vector_store %arg6[%c0_24, %c0_25], %66 {strides = array<i32>} : memref<16x128xbf16, #tpu.memory_space<vmem>>, vector<16x128xbf16>,
    return
  }
  func.func @transform_0(%arg0: i32) -> (i32, i32) {
    %c0_i32 = arith.constant 0 : i32
    %c0_i32_0 = arith.constant 0 : i32
    return %c0_i32, %arg0 : i32, i32
  }
  func.func @transform_1(%arg0: i32) -> (i32, i32) {
    %c0_i32 = arith.constant 0 : i32
    %c0_i32_0 = arith.constant 0 : i32
    %c0_i32_1 = arith.constant 0 : i32
    return %c0_i32, %c0_i32_0 : i32, i32
  }
  func.func @transform_2(%arg0: i32) -> (i32, i32) {
    %c0_i32 = arith.constant 0 : i32
    %c0_i32_0 = arith.constant 0 : i32
    %c0_i32_1 = arith.constant 0 : i32
    return %c0_i32, %c0_i32_0 : i32, i32
  }
  func.func @transform_3(%arg0: i32) -> (i32, i32) {
    %c0_i32 = arith.constant 0 : i32
    %c0_i32_0 = arith.constant 0 : i32
    %c0_i32_1 = arith.constant 0 : i32
    return %c0_i32, %c0_i32_0 : i32, i32
  }
  func.func @transform_4(%arg0: i32) -> (i32, i32) {
    %c0_i32 = arith.constant 0 : i32
    %c0_i32_0 = arith.constant 0 : i32
    %c0_i32_1 = arith.constant 0 : i32
    return %c0_i32, %c0_i32_0 : i32, i32
  }
  func.func @transform_5(%arg0: i32) -> (i32, i32) {
    %c0_i32 = arith.constant 0 : i32
    %c0_i32_0 = arith.constant 0 : i32
    return %c0_i32, %arg0 : i32, i32
  }
}

</mosaic_0001>

<bundles_post_ra>
// kernel: tpu_custom_call.1
= control target key start
LH: loop header
LB: loop body
LE: loop exit
PB: predicated region body
PF: predicated region fallthrough
CT: control target
= control target key end

     0   :  { %10 = vsyncpa [#allocation3], 0  ;;  %s783_s0 = inlined_call_operand.vmem [shape: bf16[8,256], index: 0, kind: input, shape index: {}]   ;;  %s784_s1 = inlined_call_operand.vmem [shape: bf16[32,24], index: 1, kind: input, shape index: {}]   ;;  %s785_s2 = inlined_call_operand.vmem [shape: f32[32,1], index: 2, kind: input, shape index: {}]   ;;  %s786_s3 = inlined_call_operand.vmem [shape: bf16[16,48], index: 3, kind: input, shape index: {}]   ;;  %s787_s4 = inlined_call_operand.vmem [shape: f32[16,1], index: 4, kind: input, shape index: {}]   ;;  %s788_s5 = inlined_call_operand.hbm [shape: bf16[16,256], index: 5, kind: output, shape index: {}]  }
   0x1   :  { %12 = vsyncpa [#allocation3 + $0x1], 0  ;;  %s660_s18 = smov 0   ;;  %s662_s19 = smov 0  }
   0x2   :  { %s664_s20 = smov 0   ;;  %s666_s21 = smov 0  }
   0x3 LB: > { %s681_s22 = sadd.s32 4294967295, %s623_s21   ;;  %s460_s23 = sadd.s32 4294967294, %s623_s21   ;;  %s623_s21 = sphi %s666_s21, %s794_s21   ;;  %s619_s20 = sphi %s664_s20, %s793_s20   ;;  %s615_s19 = sphi %s662_s19, %s792_s19   ;;  %s611_s18 = sphi %s660_s18, %s791_s18  }
   0x4   : > { %s685_s24 = sadd.s32 1, %s623_s21   ;;  %s135_s25 = sadd.s32 1, %s619_s20 }
   0x5   : > { %s132_s26 = ssub.s32 %s623_s21, %s685_s24  ;;  %p145_p0 = scmp.ne.s32.totalorder %s619_s20, %s615_s19 }
   0x6   : > { %p133_p1 = scmp.eq.s32.totalorder %s132_s26, 0  ;;  %p146_p2 = scmp.eq.s32.totalorder %s681_s22, 1 }
   0x7   : > { %p151_p3 = scmp.ne.s32.totalorder %s615_s19, %s611_s18  ;;  %p152_p4 = scmp.eq.s32.totalorder %s460_s23, 1 }
   0x8   : > { %s696_s27 = scalar_select %p133_p1, %s619_s20, %s135_s25  }
   0x9   : > { %p698_p5 = por %p146_p2, %p145_p0  ;;  %p702_p6 = por %p152_p4, %p151_p3 }
   0xa   : > { %p463_p7 = scmp.ge.s32.totalorder %s623_s21, 1  ;;  %p189_p8 = scmp.lt.s32.totalorder %s623_s21, 3 }
   0xc   : > { %p190_p9 = pnand %p463_p7, %p189_p8 }
   0xd   : > { %p216_p10 = scmp.lt.s32.totalorder (!%p190_p9), %s681_s22, 1  ;;  %s626_s10 = smov (!%p190_p9), 4  }
   0xe   : > { %193 = sbr.rel (%p190_p9) target bundleno = 548 (0x224), region = 40  ;;  %s627_s11 = smov (!%p190_p9), 2  }
   0xf   : > { %s213_s15 = sand.u32 (!%p190_p9), 1, %s615_s19   ;;  %s491_s17 = sshll.u32 (!%p190_p9), %s681_s22, 2 }
  0x10   : > { %s464_s16 = sshll.u32 (!%p190_p9), %s213_s15, 3  ;;  %s394_s26 = scalar_lea.hbm (!%p190_p9), %s788_s5, %s491_s17 }
  0x11   : > { %s397_s7 = sshll.u32 (!%p190_p9), %s394_s26, 4  ;;  %s398_s7 = int_to_ptr.hbm [resolvable:$true] %s397_s7 }
  0x12   : > { %s575_s8 = sshra.s32 (!%p190_p9), %s398_s7, 4  ;;  %s576_s8 = int_to_ptr.hbm [resolvable:$true] %s575_s8 }
  0x13   : > { %v625_v0 = vmov 0   ;;  %s217_s30 = scalar_select %p216_p10, %s681_s22, 1  ;;  %v255_v3 = vld [vmem:[%s785_s2] sm:$0xff]  ;;  %vm296_vm0 = vcmask 1043456   ;;  %v256_v6 = vld [vmem:[%s785_s2 + $0x8] sm:$0xff]  ;;  %v258_v8 = vld [vmem:[%s785_s2 + $0x18] sm:$0xff]  ;;  %v221_v9 = vlaneseq }
  0x14   : > { %548 = vset.pattern.permute.xlu1 %v625_v0  ;;  %559 = vset.pattern.permute.xlu0 %v625_v0  ;;  %v339_v7 = vld [vmem:[%s787_s4 + $0x8] sm:$0xff]  ;;  %v494_v14 = vld [vmem:[%s784_s1] sm:$0xff]  ;;  %vm289_vm4 = vcmask 195584   ;;  %v257_v27 = vld [vmem:[%s785_s2 + $0x10] sm:$0xff]  ;;  %vm355_vm7 = vcmask 392192   ;;  %s384_s22 = scalar_lea.sflag [#allocation3], %s213_s15  ;;  %p582_p0 = scmp.lt.s32.totalorder %s576_s8, %s788_s5 }
  0x15   : > { %560 = vset.pattern.permute.xlu2 %v625_v0  ;;  %s465_s6 = sshll.u32 %s217_s30, 2  ;;  %261 = vperm.xlu1 %548, %v255_v3   ;;  %v222_v11 = vand.u32 127, %v221_v9  ;;  %v495_v15 = vld [vmem:[%s784_s1 + $0x8] sm:$0xff]  ;;  %v338_v26 = vld [vmem:[%s787_s4] sm:$0xff]  ;;  %s215_s30 = scalar_lea.vmem [#allocation2], %s464_s16 }
  0x16   : > { %s219_s9 = scalar_lea.vmem %s783_s0, %s465_s6  ;;  %v496_v36 = vld [vmem:[%s786_s3] sm:$0xff]  ;;  %s395_s6 = sshll.u32 %s215_s30, 4  ;;  %s396_s6 = int_to_ptr.vmem [resolvable:$true] %s395_s6 }
  0x17   : > { %v237_v1 = vld [vmem:[%s219_s9] sm:$0xf]  ;;  %vm235_vm1 = vcmp.ge.s32.totalorder %v222_v11, 2  ;;  %vm236_vm2 = vcmp.ge.s32.totalorder %v222_v11, 4  ;;  %s577_s9 = scalar_lea.hbm %s576_s8, 8 }
  0x18   : > { %v238_v2 = vunpack.c.l.bf16 %v237_v1  ;;  %vm474_vm3 = vmpackc.low %vm235_vm1, %vm236_vm2  ;;  %p578_p11 = scmp.ne.s32.totalorder %s576_s8, %s577_s9 }
  0x19   : > { %vm483_vm5 = vmpackc.low %vm235_vm1, %vm235_vm1 }
  0x1a   : > { %239 = vrot.lane.b32.xlu0 %v238_v2, %s626_s10  ;;  %v250_v4 = vpack.c.bf16 %v238_v2, %v238_v2  ;;  %vm486_vm6 = vmpackc.low %vm236_vm2, %vm236_vm2  ;;  %p579_p12 = pnand %p578_p11, %p698_p5 }
  0x1c   : > { %v298_v5 = vsel %vm296_vm0, %v250_v4, 0  ;;  %p580_p13 = pneg %p579_p12 }
  0x1d   : > { %306 = vmatpush.bf16.msra.mxu0 %v298_v5  ;;  %502 = vmatpush.bf16.msra.mxu2 %v298_v5 }
  0x1e   : > { %266 = vperm.xlu1 %548, %v256_v6  }
  0x22   : > { %244 = vrot.lane.b32.xlu0 %v238_v2, %s627_s11 }
  0x26   : > { %347 = vperm.xlu1 %548, %v339_v7  }
  0x2a   : > { %342 = vperm.xlu0 %559, %v338_v26  }
  0x2e   : > { %276 = vperm.xlu1 %548, %v258_v8  }
  0x87   : > { %v262_v16 = vpop.permute.xlu1 %261 }
  0x8c   : > { %v240_v10 = vpop.permute.xlu0 %239 }
  0x90   : > { %v267_v19 = vpop.permute.xlu1 %266 }
  0x94   : > { %v245_v12 = vpop.permute.xlu0 %244 }
  0x95   : > { %v475_v13 = vpack.c.bf16 %v245_v12, %v240_v10 }
  0x97   : > { %476 = vmatpush.bf16.msk.msra.mxu0 %vm474_vm3, %v475_v13  ;;  %503 = vmatpush.bf16.msk.msra.mxu2 %vm474_vm3, %v475_v13 }
  0x98   : > { %v348_v38 = vpop.permute.xlu1 %347 }
  0x9a   : > { %477 = vmatmul.msk.bf16.vlgmr.msra.gmra.mxu0 %vm289_vm4, %v494_v14  ;;  %478 = vmatmul.msk.bf16.vlgmr.msra.gmra.mxu2 %vm289_vm4, %v495_v15 }
  0x9c   : > { %v343_v39 = vpop.permute.xlu0 %342 }
  0xa0   : > { %v277_v48 = vpop.permute.xlu1 %276 }
 0x117   : > { %v309_v17 = vpop.f32.mrf.mxu0 }
 0x118   : > { %v310_v18 = vadd.f32 %v309_v17, %v262_v16 }
 0x11a   : > { %v319_v22 = vmax.f32 %v310_v18, 0.0 }
 0x11d   : > { %v314_v37 = vpop.f32.mrf.mxu2 }
 0x11f   : > { %v311_v20 = vpop.f32.mrf.mxu0 }
 0x120   : > { %v312_v21 = vadd.f32 %v311_v20, %v267_v19 }
 0x122   : > { %v320_v23 = vmax.f32 %v312_v21, 0.0 }
 0x124   : > { %v549_v24 = vpack.i.bf16 %v320_v23, %v319_v22  ;;  %v335_v25 = vpack.c.bf16 %v320_v23, %v319_v22 }
 0x125   : > { %v316_v45 = vpop.f32.mrf.mxu2 }
 0x126   : > { %550 = vrot.lane.b32.xlu2 %v549_v24, %s627_s11  ;;  %364 = vmatpush.bf16.msra.mxu1 %v335_v25  ;;  %v317_v49 = vadd.f32 %v316_v45, %v277_v48  ;;  %s581_s11 = scalar_lea.hbm %s788_s5, 16 }
 0x127   : > { %p583_p1 = scmp.lt.s32.totalorder %s581_s11, %s577_s9 }
 0x129   : > { %p584_p2 = por %p583_p1, %p582_p0 }
 0x12b   : > { %p585_p3 = pnand %p584_p2, %p580_p13 }
 0x12e   : > { %555 = vrot.lane.b32.xlu2 %v549_v24, %s626_s10 }
 0x136   : > { %271 = vperm.xlu2 %560, %v257_v27  }
 0x180   : > { %v551_v28 = vpop.permute.xlu2 %550 }
 0x181   : > { %v553_v29 = vunpack.i.h.bf16 %v551_v28  ;;  %v552_v30 = vunpack.i.l.bf16 %v551_v28 }
 0x183   : > { %v484_v31 = vpack.c.bf16 %v553_v29, %v552_v30 }
 0x185   : > { %485 = vmatpush.bf16.msk.msra.mxu1 %vm483_vm5, %v484_v31 }
 0x188   : > { %v556_v32 = vpop.permute.xlu2 %555 }
 0x189   : > { %v558_v33 = vunpack.i.h.bf16 %v556_v32  ;;  %v557_v34 = vunpack.i.l.bf16 %v556_v32 }
 0x18b   : > { %v487_v35 = vpack.c.bf16 %v558_v33, %v557_v34 }
 0x18d   : > { %488 = vmatpush.bf16.msk.msra.mxu1 %vm486_vm6, %v487_v35 }
 0x190   : > { %489 = vmatmul.msk.bf16.vlgmr.msra.gmra.mxu1 %vm355_vm7, %v496_v36  ;;  %v272_v42 = vpop.permute.xlu2 %271 }
 0x191   : > { %v315_v44 = vadd.f32 %v314_v37, %v272_v42 }
 0x20d   : > { %v368_v40 = vpop.f32.mrf.mxu1 }
 0x20e   : > { %v369_v41 = vadd.f32 %v368_v40, %v343_v39 }
 0x210   : > { %v373_v43 = vmax.f32 %v369_v41, 0.0 }
 0x212   : > { %v375_v50 = vadd.f32 %v373_v43, %v315_v44 }
 0x214   : > { %v377_v53 = vmax.f32 %v375_v50, 0.0 }
 0x215   : > { %v370_v46 = vpop.f32.mrf.mxu1 }
 0x216   : > { %v371_v47 = vadd.f32 %v370_v46, %v348_v38 }
 0x218   : > { %v374_v51 = vmax.f32 %v371_v47, 0.0 }
 0x21a   : > { %v376_v52 = vadd.f32 %v374_v51, %v317_v49 }
 0x21c   : > { %v378_v54 = vmax.f32 %v376_v52, 0.0 }
 0x21e   : > { %v500_v55 = vpack.c.bf16 %v378_v54, %v377_v53 }
 0x220   : > { %501 = vst [vmem:[%s215_s30] sm:$0xff] %v500_v55  }
 0x221   : > { %588 = shalt.err (!%p585_p3)
}
 0x222   : > { %s628_s15 = smov 64   ;;  %s629_s17 = smov 128  }
 0x223   : > { %504 = dma.vmem_to_hbm [thread:$0]  (%p698_p5), %s396_s6, 128, %s398_s7, %s384_s22, %s628_s15, %s629_s17, %s626_s10  }
 0x224 PF: > { %p510_p4 = scmp.ge.s32.totalorder %s623_s21, 2  ;;  %s412_s23 = sand.u32 1, %s611_s18  }
 0x225   : > { %s413_s25 = scalar_lea.sflag [#allocation3], %s412_s23 }
 0x226   : > { %p507_p7 = pnand %p510_p4, %p702_p6 }
 0x228   : > { %p508_p8 = pneg %p507_p7 }
 0x22a   : > { %606 = dma.done.wait (%p508_p8), %s413_s25, 128  }
 0x22b   : > { %608 = vsyncadd (%p508_p8), %s413_s25, 4294967168  ;;  %p15_p9 = scmp.ge.s32.totalorder %s685_s24, 4   ;;  %s791_s18 = smov %s615_s19 }
 0x22c   : > { %s792_s19 = smov %s619_s20  ;;  %s793_s20 = smov %s696_s27 }
 0x22d   : > { %s794_s21 = smov %s685_s24  ;;  %17 = sbr.rel (!%p15_p9) target bundleno = 3 (0x3), region = 75 }
 0x232   :  { %419 = vsyncpa [#allocation3], 1 }
 0x233   :  { %421 = vsyncpa [#allocation3 + $0x1], 1 }

</bundles_post_ra>
